<compile_context>
chip_gen: v5e
topology: v5e:2x2
jax: 0.10.0
libtpu: 0.0.40
codegen_flags: <defaults>
</compile_context>

<pallas_src>
import jax
import jax.numpy as jnp
from jax.experimental import pallas as pl
from jax.experimental.pallas import tpu as pltpu


def _make_dma_copy_kernel(axis, chunk, last_chunk, num_chunks):
    """Build a kernel where each grid step DMAs one disjoint chunk HBM->HBM.

    `axis`, `chunk`, `last_chunk`, `num_chunks` are static Python ints, so the
    branch structure below is resolved at trace time and every DMA has a
    static size.
    """

    def kernel(x_hbm, o_hbm, sem):
        i = pl.program_id(0)
        start = i * chunk  # dynamic start, static sizes

        def copy(size):
            if axis == 0:
                src = x_hbm.at[pl.ds(start, size), :]
                dst = o_hbm.at[pl.ds(start, size), :]
            else:  # axis == 1 (only used when N == 1, so the slice is contiguous)
                src = x_hbm.at[:, pl.ds(start, size)]
                dst = o_hbm.at[:, pl.ds(start, size)]
            cp = pltpu.make_async_copy(src, dst, sem)
            cp.start()
            cp.wait()

        if last_chunk == chunk:
            # All chunks have the same static size.
            copy(chunk)
        else:
            @pl.when(i < num_chunks - 1)
            def _():
                copy(chunk)

            @pl.when(i == num_chunks - 1)
            def _():
                copy(last_chunk)

    return kernel


def flatten_layer(x):
    """Pallas equivalent of FlattenLayer.forward: (N, ...) -> (N, prod(rest))."""
    n = x.shape[0]
    flat = 1
    for d in x.shape[1:]:
        flat *= d

    # Metadata-only reshape (contiguous row-major), same element ordering as
    # torch .view — no data movement happens here.
    x2d = x.reshape(n, flat)

    if n == 0 or flat == 0:
        return x2d  # nothing to copy

    # Chunk selection: try to get >= 2 disjoint chunks so a "parallel" grid
    # axis lets v7x shard the DMAs across both TensorCores.
    if n >= 2:
        axis = 0
        num_chunks = 2
        chunk = pl.cdiv(n, 2)
        last_chunk = n - chunk
    elif flat >= 256:
        # Single row: split the (contiguous) flat axis, lane-aligned chunk.
        axis = 1
        num_chunks = 2
        chunk = 128 * pl.cdiv(pl.cdiv(flat, 2), 128)
        last_chunk = flat - chunk
    else:
        axis = 0
        num_chunks = 1
        chunk = n
        last_chunk = n

    itemsize = jnp.dtype(x.dtype).itemsize
    kernel = _make_dma_copy_kernel(axis, chunk, last_chunk, num_chunks)

    return pl.pallas_call(
        kernel,
        out_shape=jax.ShapeDtypeStruct((n, flat), x.dtype),
        grid_spec=pltpu.PrefetchScalarGridSpec(
            num_scalar_prefetch=0,
            grid=(num_chunks,),
            # Raw HBM refs in and out — no auto-DMA, no VMEM staging.
            in_specs=[pl.BlockSpec(memory_space=pl.ANY)],
            out_specs=pl.BlockSpec(memory_space=pl.ANY),
            scratch_shapes=[pltpu.SemaphoreType.DMA],
        ),
        compiler_params=pltpu.CompilerParams(
            # Disjoint chunks -> safe to shard across v7x's two TensorCores.
            dimension_semantics=("parallel",),
        ),
        cost_estimate=pl.CostEstimate(
            flops=0,
            transcendentals=0,
            bytes_accessed=2 * n * flat * itemsize,
        ),
    )(x2d)


if __name__ == "__main__":
    key = jax.random.PRNGKey(0)
    x = jax.random.normal(key, (2, 4, 16, 16), dtype=jnp.float32)

    out = flatten_layer(x)
    out = jax.block_until_ready(out)

    # Reference: plain reshape (same as torch .view on a contiguous tensor).
    ref = x.reshape(x.shape[0], -1)
    assert out.shape == (2, 4 * 16 * 16), out.shape
    assert out.dtype == x.dtype
    assert jnp.array_equal(out, ref), "mismatch vs reference flatten"

    print("KERNEL_OK")
</pallas_src>

<mosaic_0001>
module attributes {stable_mosaic.version = 11 : i64} {
  func.func @kernel(%arg0: i32, %arg1: memref<2x1024xf32, #tpu.memory_space<any>>, %arg2: memref<2x1024xf32, #tpu.memory_space<any>>, %arg3: memref<!tpu.dma_semaphore, #tpu.memory_space<semaphore_mem>>) attributes {dimension_semantics = [#tpu.dimension_semantics<parallel>], iteration_bounds = array<i64: 2>, scalar_prefetch = 0 : i64, scratch_operands = 1 : i64, tpu.core_type = #tpu.core_type<tc>, window_params = [{}, {}]} {
    %c1_i32 = arith.constant 1 : i32
    %0 = arith.muli %arg0, %c1_i32 : i32
    %c0_i32 = arith.constant 0 : i32
    %1 = tpu.memref_slice %arg1[%0, %c0_i32] : memref<2x1024xf32, #tpu.memory_space<any>> -> memref<1x1024xf32, #tpu.memory_space<any>>
    %c0_i32_0 = arith.constant 0 : i32
    %2 = tpu.memref_slice %arg2[%0, %c0_i32_0] : memref<2x1024xf32, #tpu.memory_space<any>> -> memref<1x1024xf32, #tpu.memory_space<any>>
    tpu.enqueue_dma source(%1 : memref<1x1024xf32, #tpu.memory_space<any>>) target(%2 : memref<1x1024xf32, #tpu.memory_space<any>>) target_semaphore(%arg3 : memref<!tpu.dma_semaphore, #tpu.memory_space<semaphore_mem>>)
    %c0_i32_1 = arith.constant 0 : i32
    %3 = tpu.memref_slice %arg1[%0, %c0_i32_1] : memref<2x1024xf32, #tpu.memory_space<any>> -> memref<1x1024xf32, #tpu.memory_space<any>>
    %c0_i32_2 = arith.constant 0 : i32
    %4 = tpu.memref_slice %arg2[%0, %c0_i32_2] : memref<2x1024xf32, #tpu.memory_space<any>> -> memref<1x1024xf32, #tpu.memory_space<any>>
    tpu.wait_dma2 semaphore(%arg3 : memref<!tpu.dma_semaphore, #tpu.memory_space<semaphore_mem>>) src(%3 : memref<1x1024xf32, #tpu.memory_space<any>>) dst(%4 : memref<1x1024xf32, #tpu.memory_space<any>>)
    return
  }
}

</mosaic_0001>

<bundles_post_ra>
// kernel: tpu_custom_call.1
= control target key start
LH: loop header
LB: loop body
LE: loop exit
PB: predicated region body
PF: predicated region fallthrough
CT: control target
= control target key end

     0   :  { %s78_s6 = smov 0   ;;  %s103_s0 = inlined_call_operand.hbm [shape: f32[2,1024], index: 0, kind: input, shape index: {}]   ;;  %s104_s1 = inlined_call_operand.hbm [shape: f32[2,1024], index: 1, kind: output, shape index: {}]  }
   0x1 LB: > { %s13_s7 = sshrl.u32 %s80_s6, 1  ;;  %s14_s8 = sand.u32 1, %s80_s6   ;;  %s80_s6 = sphi %s78_s6, %s11_s6  }
   0x2   : > { %s57_s9 = sshll.u32 %s13_s7, 4  ;;  %s82_s11 = smov 32  }
   0x3   : > { %s16_s10 = sadd.s32 %s57_s9, %s14_s8  ;;  %30 = sst [smem:[#allocation4]] %s82_s11 }
   0x4   : > { %s17_s14 = scalar_lea.hbm %s103_s0, %s16_s10  ;;  %s18_s17 = scalar_lea.hbm %s104_s1, %s16_s10 }
   0x5   : > { %s23_s18 = sshll.u32 %s17_s14, 4  ;;  %s25_s19 = sshll.u32 %s18_s17, 4  ;;  %s24_s18 = int_to_ptr.hbm [resolvable:$true] %s23_s18  ;;  %s26_s19 = int_to_ptr.hbm [resolvable:$true] %s25_s19 }
   0x6   : > { %32 = sst [smem:[#allocation4 + $0x1]] %s82_s11  ;;  %s83_s20 = smov 1  }
   0x7   : > { %34 = sst [smem:[#allocation4 + $0x2]] %s83_s20  ;;  %s84_s21 = smov [#allocation2]  }
   0x8   : > { %s85_s22 = smov [#allocation3]   ;;  %s86_s23 = smov 0  }
   0x9   : > { %36 = dma.general %s24_s18, 128, %s26_s19, %s84_s21, %s85_s22, [#allocation4], %s86_s23, 0  }
   0xa   : > { %76 = dma.done.wait [#allocation2], 128 }
   0xb   : > { %77 = vsyncadd [#allocation2], 4294967168  ;;  %s11_s6 = sadd.s32 1, %s80_s6  }
   0xc   : > { %p8_p0 = scmp.ge.s32.totalorder %s11_s6, 2  }
   0xe   :  { %10 = sbr.rel (!%p8_p0) target bundleno = 1 (0x1), region = 23 }
  0x13   :  { %40 = vsyncmov [#allocation2] }
  0x16   :  { %s41_s24 = vpop.sfrf %40 }
  0x17   :  { %p58_p1 = scmp.ne.s32.totalorder %s41_s24, 0 }
  0x19   :  { %45 = shalt.err (%p58_p1)  }

</bundles_post_ra>
